<compile_context>
chip_gen: v6e
topology: v6e:2x2x1
jax: 0.10.0
libtpu: 0.0.40
codegen_flags: <defaults>
</compile_context>

<pallas_src>
import jax
import jax.numpy as jnp
from jax.experimental import pallas as pl
from jax.experimental.pallas import tpu as pltpu

HID = 128        # padded hidden width (layers 1-3 all fit in 128 sublanes)
LANE = 128       # TPU lane width; batch tiles are multiples of this
MAX_TB = 1024    # upper bound on the batch (lane) tile


def _cdiv(a, b):
    return -(-a // b)


def _round_up(x, m):
    return _cdiv(x, m) * m


def mlp_kernel(xT_ref, w1t_ref, wstack_ref, bstack_ref, w4_ref, b4_ref, oT_ref):
    xT = xT_ref[...]                                  # (3, TB) f32, batch on lanes

    # Layer 1: Linear(3,128) + ReLU as 3 outer-product FMAs on the VPU (K=3 is too thin
    # for the MXU). (128,1) x (1,TB) broadcasts -> (128, TB).
    h = (w1t_ref[:, 0:1] * xT[0:1, :]
         + w1t_ref[:, 1:2] * xT[1:2, :]
         + w1t_ref[:, 2:3] * xT[2:3, :]
         + bstack_ref[:, 0:1])
    h = jnp.maximum(h, 0.0)                           # (128, TB) f32
    # Dropout(0.3): identity in eval mode.

    # Layer 2: Linear(128,128) + ReLU on the MXU, bf16 operands / f32 accumulation.
    h = jnp.dot(wstack_ref[0], h.astype(jnp.bfloat16),
                preferred_element_type=jnp.float32)
    h = jnp.maximum(h + bstack_ref[:, 1:2], 0.0)
    # Dropout(0.3): identity in eval mode.

    # Layer 3: Linear(128,64) + ReLU on the MXU (rows 64..127 are zero padding).
    h = jnp.dot(wstack_ref[1], h.astype(jnp.bfloat16),
                preferred_element_type=jnp.float32)
    h = jnp.maximum(h + bstack_ref[:, 2:3], 0.0)
    # Dropout(0.2): identity in eval mode.

    # Layer 4: Linear(64,1) as a VPU multiply over the 64 real rows + sublane reduce,
    # written as a lane-dense (1, TB) row.
    o = jnp.sum(h[0:64, :] * w4_ref[...], axis=0, keepdims=True) + b4_ref[...]
    oT_ref[...] = o.astype(oT_ref.dtype)


def prepare_params(params):
    """One-time transpose/pad/fuse of parameters (hoisted out of the per-call path)."""
    w1, b1, w2, b2, w3, b3, w4, b4 = params
    w1t = w1.T.astype(jnp.float32)                                      # (128, 3)
    w2t = w2.T.astype(jnp.float32)                                      # (128, 128)
    w3t = jnp.zeros((HID, HID), jnp.float32).at[:64, :].set(w3.T)       # (128, 128) padded
    wstack = jnp.stack([w2t, w3t]).astype(jnp.bfloat16)                 # (2, 128, 128) bf16
    bstack = (jnp.zeros((HID, 3), jnp.float32)
              .at[:, 0].set(b1).at[:, 1].set(b2).at[:64, 2].set(b3))    # (128, 3)
    w4col = w4.reshape(64, 1).astype(jnp.float32)                       # (64, 1)
    b4r = b4.reshape(1, 1).astype(jnp.float32)                          # (1, 1)
    return w1t, wstack, bstack, w4col, b4r


@jax.jit
def reimbursement_net(x, prepared):
    """x: [B, 3] float32 -> [B, 1] float32 (eval-mode forward)."""
    w1t, wstack, bstack, w4col, b4r = prepared
    B = x.shape[0]

    # Padding-aware batch tiling; force >= 2 grid steps whenever there is more than one
    # lane-tile of rows so both v7x TensorCores get work from the "parallel" axis
    # (costs only ~0.35 us of extra grid-step overhead on single-TC v5e/v6e).
    n_tiles = _cdiv(B, MAX_TB)
    if B > LANE:
        n_tiles = max(n_tiles, 2)
    TB = _round_up(_cdiv(B, n_tiles), LANE)
    n_tiles = _cdiv(B, TB)
    Bp = n_tiles * TB

    xT = x.astype(jnp.float32).T                       # (3, B): batch on lanes, dense rows
    if Bp != B:
        xT = jnp.zeros((3, Bp), jnp.float32).at[:, :B].set(xT)

    const2 = lambda i: (0, 0)                          # grid-constant weight/bias blocks
    const3 = lambda i: (0, 0, 0)

    out = pl.pallas_call(
        mlp_kernel,
        out_shape=jax.ShapeDtypeStruct((1, Bp), jnp.float32),
        grid_spec=pltpu.PrefetchScalarGridSpec(
            num_scalar_prefetch=0,
            grid=(n_tiles,),
            in_specs=[
                pl.BlockSpec((3, TB), lambda i: (0, i)),        # x^T tile (contiguous rows)
                pl.BlockSpec((HID, 3), const2),                 # W1^T
                pl.BlockSpec((2, HID, HID), const3),            # W2^T / W3^T (padded), bf16
                pl.BlockSpec((HID, 3), const2),                 # b1 / b2 / b3 columns
                pl.BlockSpec((64, 1), const2),                  # w4 column
                pl.BlockSpec((1, 1), const2),                   # b4 scalar
            ],
            out_specs=pl.BlockSpec((1, TB), lambda i: (0, i)),  # lane-dense output row
        ),
        compiler_params=pltpu.CompilerParams(
            dimension_semantics=("parallel",),                  # shard batch tiles across TCs
        ),
    )(xT, w1t, wstack, bstack, w4col, b4r)

    return out[0, :B][:, None]


def init_params(key):
    """Deterministic init matching nn.Linear default (uniform +-1/sqrt(fan_in))."""
    dims = [(3, 128), (128, 128), (128, 64), (64, 1)]
    params = []
    for i, (fin, fout) in enumerate(dims):
        kw, kb = jax.random.split(jax.random.fold_in(key, i))
        bound = 1.0 / (fin ** 0.5)
        w = jax.random.uniform(kw, (fin, fout), jnp.float32, -bound, bound)
        b = jax.random.uniform(kb, (fout,), jnp.float32, -bound, bound)
        params.extend([w, b])
    return tuple(params)


def _reference(x, params):
    w1, b1, w2, b2, w3, b3, w4, b4 = params
    h = jnp.maximum(x @ w1 + b1, 0.0)
    h = jnp.maximum(h @ w2 + b2, 0.0)
    h = jnp.maximum(h @ w3 + b3, 0.0)
    return h @ w4 + b4


if __name__ == "__main__":
    key = jax.random.PRNGKey(0)
    params = init_params(key)
    prepared = prepare_params(params)

    # Tolerances relaxed vs. the f32 PyTorch-style reference because layers 2/3 use bf16
    # MXU operands (f32 accumulation): expected deviation ~1e-3..1e-2.
    ATOL = 2e-2
    RTOL = 2e-2

    # Small primary check (B=8, single 128-wide tile + batch padding).
    B = 8
    x = jax.random.normal(jax.random.fold_in(key, 99), (B, 3), jnp.float32)
    out = jax.block_until_ready(reimbursement_net(x, prepared))
    ref = _reference(x, params)
    assert out.shape == (B, 1), out.shape
    assert jnp.allclose(out, ref, atol=ATOL, rtol=RTOL), float(jnp.max(jnp.abs(out - ref)))

    # Secondary check exercising the forced-2-tile grid (TB=384) + padding path.
    B2 = 600
    x2 = jax.random.normal(jax.random.fold_in(key, 123), (B2, 3), jnp.float32)
    out2 = jax.block_until_ready(reimbursement_net(x2, prepared))
    ref2 = _reference(x2, params)
    assert out2.shape == (B2, 1), out2.shape
    assert jnp.allclose(out2, ref2, atol=ATOL, rtol=RTOL), float(jnp.max(jnp.abs(out2 - ref2)))

    print("KERNEL_OK")
</pallas_src>

<mosaic_0001>
module attributes {stable_mosaic.version = 11 : i64} {
  func.func @mlp_kernel(%arg0: i32, %arg1: memref<3x128xf32, #tpu.memory_space<vmem>>, %arg2: memref<128x3xf32, #tpu.memory_space<vmem>>, %arg3: memref<2x128x128xbf16, #tpu.memory_space<vmem>>, %arg4: memref<128x3xf32, #tpu.memory_space<vmem>>, %arg5: memref<64x1xf32, #tpu.memory_space<vmem>>, %arg6: memref<1x1xf32, #tpu.memory_space<vmem>>, %arg7: memref<1x128xf32, #tpu.memory_space<vmem>>) attributes {dimension_semantics = [#tpu.dimension_semantics<parallel>], iteration_bounds = array<i64: 1>, scalar_prefetch = 0 : i64, scratch_operands = 0 : i64, tpu.core_type = #tpu.core_type<tc>, window_params = [{transform_indices = @transform_0, window_bounds = array<i64: 3, 128>}, {pipeline_mode = #tpu.pipeline_mode<synchronous>, transform_indices = @transform_1, window_bounds = array<i64: 128, 3>}, {pipeline_mode = #tpu.pipeline_mode<synchronous>, transform_indices = @transform_2, window_bounds = array<i64: 2, 128, 128>}, {pipeline_mode = #tpu.pipeline_mode<synchronous>, transform_indices = @transform_3, window_bounds = array<i64: 128, 3>}, {pipeline_mode = #tpu.pipeline_mode<synchronous>, transform_indices = @transform_4, window_bounds = array<i64: 64, 1>}, {pipeline_mode = #tpu.pipeline_mode<synchronous>, transform_indices = @transform_5, window_bounds = array<i64: 1, 1>}, {transform_indices = @transform_6, window_bounds = array<i64: 1, 128>}]} {
    %c0 = arith.constant 0 : index
    %c0_0 = arith.constant 0 : index
    %0 = vector.load %arg1[%c0, %c0_0] : memref<3x128xf32, #tpu.memory_space<vmem>>, vector<3x128xf32>
    %c0_1 = arith.constant 0 : index
    %c0_2 = arith.constant 0 : index
    %1 = vector.load %arg2[%c0_1, %c0_2] : memref<128x3xf32, #tpu.memory_space<vmem>>, vector<128x1xf32>
    %2 = vector.extract_strided_slice %0 {offsets = [0, 0], sizes = [1, 128], strides = [1, 1]} : vector<3x128xf32> to vector<1x128xf32>
    %3 = vector.broadcast %1 : vector<128x1xf32> to vector<128x128xf32>
    %4 = vector.broadcast %2 : vector<1x128xf32> to vector<128x128xf32>
    %5 = arith.mulf %3, %4 : vector<128x128xf32>
    %c0_3 = arith.constant 0 : index
    %c1 = arith.constant 1 : index
    %6 = vector.load %arg2[%c0_3, %c1] : memref<128x3xf32, #tpu.memory_space<vmem>>, vector<128x1xf32>
    %7 = vector.extract_strided_slice %0 {offsets = [1, 0], sizes = [1, 128], strides = [1, 1]} : vector<3x128xf32> to vector<1x128xf32>
    %8 = vector.broadcast %6 : vector<128x1xf32> to vector<128x128xf32>
    %9 = vector.broadcast %7 : vector<1x128xf32> to vector<128x128xf32>
    %10 = arith.mulf %8, %9 : vector<128x128xf32>
    %11 = arith.addf %5, %10 : vector<128x128xf32>
    %c0_4 = arith.constant 0 : index
    %c2 = arith.constant 2 : index
    %12 = vector.load %arg2[%c0_4, %c2] : memref<128x3xf32, #tpu.memory_space<vmem>>, vector<128x1xf32>
    %13 = vector.extract_strided_slice %0 {offsets = [2, 0], sizes = [1, 128], strides = [1, 1]} : vector<3x128xf32> to vector<1x128xf32>
    %14 = vector.broadcast %12 : vector<128x1xf32> to vector<128x128xf32>
    %15 = vector.broadcast %13 : vector<1x128xf32> to vector<128x128xf32>
    %16 = arith.mulf %14, %15 : vector<128x128xf32>
    %17 = arith.addf %11, %16 : vector<128x128xf32>
    %c0_5 = arith.constant 0 : index
    %c0_6 = arith.constant 0 : index
    %18 = vector.load %arg4[%c0_5, %c0_6] : memref<128x3xf32, #tpu.memory_space<vmem>>, vector<128x1xf32>
    %19 = vector.broadcast %18 : vector<128x1xf32> to vector<128x128xf32>
    %20 = arith.addf %17, %19 : vector<128x128xf32>
    %cst = arith.constant 0.000000e+00 : f32
    %21 = vector.broadcast %cst : f32 to vector<128x128xf32>
    %22 = arith.maximumf %20, %21 : vector<128x128xf32>
    %c0_7 = arith.constant 0 : index
    %c0_8 = arith.constant 0 : index
    %c0_9 = arith.constant 0 : index
    %23 = vector.load %arg3[%c0_7, %c0_8, %c0_9] : memref<2x128x128xbf16, #tpu.memory_space<vmem>>, vector<1x128x128xbf16>
    %24 = vector.shape_cast %23 : vector<1x128x128xbf16> to vector<128x128xbf16>
    %25 = arith.truncf %22 : vector<128x128xf32> to vector<128x128xbf16>
    %cst_10 = arith.constant dense<0.000000e+00> : vector<128x128xf32>
    %26 = tpu.matmul %24, %25, %cst_10 {dimension_numbers = #tpu.dot_dimension_numbers<[1], [0], [0], [1], [0, 0, 1, 1], [], []>} : vector<128x128xbf16>, vector<128x128xbf16>, vector<128x128xf32> -> vector<128x128xf32>
    %c0_11 = arith.constant 0 : index
    %c1_12 = arith.constant 1 : index
    %27 = vector.load %arg4[%c0_11, %c1_12] : memref<128x3xf32, #tpu.memory_space<vmem>>, vector<128x1xf32>
    %28 = vector.broadcast %27 : vector<128x1xf32> to vector<128x128xf32>
    %29 = arith.addf %26, %28 : vector<128x128xf32>
    %cst_13 = arith.constant 0.000000e+00 : f32
    %30 = vector.broadcast %cst_13 : f32 to vector<128x128xf32>
    %31 = arith.maximumf %29, %30 : vector<128x128xf32>
    %c1_14 = arith.constant 1 : index
    %c0_15 = arith.constant 0 : index
    %c0_16 = arith.constant 0 : index
    %32 = vector.load %arg3[%c1_14, %c0_15, %c0_16] : memref<2x128x128xbf16, #tpu.memory_space<vmem>>, vector<1x128x128xbf16>
    %33 = vector.shape_cast %32 : vector<1x128x128xbf16> to vector<128x128xbf16>
    %34 = arith.truncf %31 : vector<128x128xf32> to vector<128x128xbf16>
    %cst_17 = arith.constant dense<0.000000e+00> : vector<128x128xf32>
    %35 = tpu.matmul %33, %34, %cst_17 {dimension_numbers = #tpu.dot_dimension_numbers<[1], [0], [0], [1], [0, 0, 1, 1], [], []>} : vector<128x128xbf16>, vector<128x128xbf16>, vector<128x128xf32> -> vector<128x128xf32>
    %c0_18 = arith.constant 0 : index
    %c2_19 = arith.constant 2 : index
    %36 = vector.load %arg4[%c0_18, %c2_19] : memref<128x3xf32, #tpu.memory_space<vmem>>, vector<128x1xf32>
    %37 = vector.broadcast %36 : vector<128x1xf32> to vector<128x128xf32>
    %38 = arith.addf %35, %37 : vector<128x128xf32>
    %cst_20 = arith.constant 0.000000e+00 : f32
    %39 = vector.broadcast %cst_20 : f32 to vector<128x128xf32>
    %40 = arith.maximumf %38, %39 : vector<128x128xf32>
    %41 = vector.extract_strided_slice %40 {offsets = [0, 0], sizes = [64, 128], strides = [1, 1]} : vector<128x128xf32> to vector<64x128xf32>
    %c0_21 = arith.constant 0 : index
    %c0_22 = arith.constant 0 : index
    %42 = vector.load %arg5[%c0_21, %c0_22] : memref<64x1xf32, #tpu.memory_space<vmem>>, vector<64x1xf32>
    %43 = vector.broadcast %42 : vector<64x1xf32> to vector<64x128xf32>
    %44 = arith.mulf %41, %43 : vector<64x128xf32>
    %cst_23 = arith.constant dense<0.000000e+00> : vector<128xf32>
    %45 = vector.multi_reduction <add>, %44, %cst_23 [0] : vector<64x128xf32> to vector<128xf32>
    %46 = vector.shape_cast %45 : vector<128xf32> to vector<1x128xf32>
    %c0_24 = arith.constant 0 : index
    %c0_25 = arith.constant 0 : index
    %47 = vector.load %arg6[%c0_24, %c0_25] : memref<1x1xf32, #tpu.memory_space<vmem>>, vector<1x1xf32>
    %48 = vector.broadcast %47 : vector<1x1xf32> to vector<1x128xf32>
    %49 = arith.addf %46, %48 : vector<1x128xf32>
    %c0_26 = arith.constant 0 : index
    %c0_27 = arith.constant 0 : index
    %50 = vector.load %arg7[%c0_26, %c0_27] : memref<1x128xf32, #tpu.memory_space<vmem>>, vector<1x128xf32>
    tpu.vector_store %arg7[%c0_26, %c0_27], %49 {strides = array<i32>} : memref<1x128xf32, #tpu.memory_space<vmem>>, vector<1x128xf32>,
    return
  }
  func.func @transform_0(%arg0: i32) -> (i32, i32) {
    %c0_i32 = arith.constant 0 : i32
    %c0_i32_0 = arith.constant 0 : i32
    return %c0_i32, %arg0 : i32, i32
  }
  func.func @transform_1(%arg0: i32) -> (i32, i32) {
    %c0_i32 = arith.constant 0 : i32
    %c0_i32_0 = arith.constant 0 : i32
    %c0_i32_1 = arith.constant 0 : i32
    return %c0_i32, %c0_i32_0 : i32, i32
  }
  func.func @transform_2(%arg0: i32) -> (i32, i32, i32) {
    %c0_i32 = arith.constant 0 : i32
    %c0_i32_0 = arith.constant 0 : i32
    %c0_i32_1 = arith.constant 0 : i32
    %c0_i32_2 = arith.constant 0 : i32
    return %c0_i32, %c0_i32_0, %c0_i32_1 : i32, i32, i32
  }
  func.func @transform_3(%arg0: i32) -> (i32, i32) {
    %c0_i32 = arith.constant 0 : i32
    %c0_i32_0 = arith.constant 0 : i32
    %c0_i32_1 = arith.constant 0 : i32
    return %c0_i32, %c0_i32_0 : i32, i32
  }
  func.func @transform_4(%arg0: i32) -> (i32, i32) {
    %c0_i32 = arith.constant 0 : i32
    %c0_i32_0 = arith.constant 0 : i32
    %c0_i32_1 = arith.constant 0 : i32
    return %c0_i32, %c0_i32_0 : i32, i32
  }
  func.func @transform_5(%arg0: i32) -> (i32, i32) {
    %c0_i32 = arith.constant 0 : i32
    %c0_i32_0 = arith.constant 0 : i32
    %c0_i32_1 = arith.constant 0 : i32
    return %c0_i32, %c0_i32_0 : i32, i32
  }
  func.func @transform_6(%arg0: i32) -> (i32, i32) {
    %c0_i32 = arith.constant 0 : i32
    %c0_i32_0 = arith.constant 0 : i32
    return %c0_i32, %arg0 : i32, i32
  }
}

</mosaic_0001>

<bundles_post_ra>
// kernel: reimbursement_net.1
= control target key start
LH: loop header
LB: loop body
LE: loop exit
PB: predicated region body
PF: predicated region fallthrough
CT: control target
= control target key end

     0   :  { %v1216_v0 = vmov 2   ;;  %v1217_v1 = vmov 1   ;;  %v1218_v7 = vmov 0   ;;  %v123_v43 = vlaneseq  ;;  %s1648_s1 = inlined_call_operand.vmem [shape: f32[128,3], index: 1, kind: input, shape index: {}]   ;;  %s1649_s3 = inlined_call_operand.vmem [shape: f32[128,3], index: 3, kind: input, shape index: {}]   ;;  %s1650_s0 = inlined_call_operand.vmem [shape: f32[3,128], index: 0, kind: input, shape index: {}]   ;;  %s1651_s2 = inlined_call_operand.vmem [shape: bf16[2,128,128], index: 2, kind: input, shape index: {}]   ;;  %s1652_s4 = inlined_call_operand.vmem [shape: f32[64,1], index: 4, kind: input, shape index: {}]   ;;  %s1653_s5 = inlined_call_operand.<no memory space> [shape: f32[1,1], index: 5, kind: input, shape index: {}]   ;;  %s1654_s6 = inlined_call_operand.vmem [shape: f32[1,128], index: 6, kind: output, shape index: {}]  }
   0x1   :  { %1163 = vset.pattern.permute.xlu0 %v1216_v0  ;;  %1162 = vset.pattern.permute.xlu1 %v1217_v1  ;;  %v41_v2 = vld [vmem:[%s1648_s1 + $0x70] sm:$0xff]  ;;  %v42_v3 = vld [vmem:[%s1648_s1 + $0x78] sm:$0xff]  ;;  %v39_v4 = vld [vmem:[%s1648_s1 + $0x60] sm:$0xff] }
   0x2   :  { %300 = vperm.xlu0 %1163, %v41_v2   ;;  %200 = vperm.xlu1 %1162, %v41_v2   ;;  %v38_v5 = vld [vmem:[%s1648_s1 + $0x58] sm:$0xff]  ;;  %v37_v6 = vld [vmem:[%s1648_s1 + $0x50] sm:$0xff]  ;;  %v36_v8 = vld [vmem:[%s1648_s1 + $0x48] sm:$0xff]  ;;  %v1438_v47 = vshrl.u32 %v123_v43, 7 }
   0x3   :  { %v1281_v9 = vld [vmem:[%s1648_s1 + $0x38] sm:$0xff]  ;;  %v40_v10 = vld [vmem:[%s1648_s1 + $0x68] sm:$0xff]  ;;  %v1303_v13 = vld [vmem:[%s1649_s3 + $0x70] sm:$0xff] }
   0x4   :  { %v1290_v11 = vld [vmem:[%s1648_s1 + $0x28] sm:$0xff]  ;;  %v1296_v12 = vld [vmem:[%s1648_s1 + $0x18] sm:$0xff]  ;;  %v35_v16 = vld [vmem:[%s1648_s1 + $0x40] sm:$0xff]  ;;  %v209_v51 = vsub.s32 1, %v1438_v47  ;;  %v125_v53 = vsub.s32 0, %v1438_v47  ;;  %v309_v57 = vsub.s32 2, %v1438_v47 }
   0x5   :  { %v1308_v14 = vld [vmem:[%s1648_s1 + $0x8] sm:$0xff]  ;;  %v358_v15 = vld [vmem:[%s1649_s3 + $0x78] sm:$0xff]  ;;  %v1325_v17 = vld [vmem:[%s1649_s3 + $0x60] sm:$0xff] }
   0x6   :  { %204 = vperm.xlu1 %1162, %v42_v3   ;;  %292 = vperm.xlu0 %1163, %v39_v4   ;;  %v353_v18 = vld [vmem:[%s1649_s3 + $0x50] sm:$0xff]  ;;  %v1335_v19 = vld [vmem:[%s1649_s3 + $0x68] sm:$0xff]  ;;  %v351_v20 = vld [vmem:[%s1649_s3 + $0x40] sm:$0xff] }
   0x7   :  { %v1347_v21 = vld [vmem:[%s1649_s3 + $0x30] sm:$0xff]  ;;  %v1355_v22 = vld [vmem:[%s1649_s3 + $0x20] sm:$0xff]  ;;  %v1360_v23 = vld [vmem:[%s1649_s3 + $0x58] sm:$0xff] }
   0x8   :  { %v33_v24 = vld [vmem:[%s1648_s1 + $0x30] sm:$0xff]  ;;  %v1379_v26 = vld [vmem:[%s1649_s3 + $0x8] sm:$0xff]  ;;  %v31_v28 = vld [vmem:[%s1648_s1 + $0x20] sm:$0xff] }
   0x9   :  { %v1372_v25 = vld [vmem:[%s1649_s3 + $0x10] sm:$0xff]  ;;  %v1388_v27 = vld [vmem:[%s1649_s3 + $0x48] sm:$0xff]  ;;  %v1403_v29 = vld [vmem:[%s1649_s3] sm:$0xff] }
   0xa   :  { %1164 = vset.pattern.permute.xlu1 %v1216_v0  ;;  %288 = vperm.xlu0 %1163, %v38_v5   ;;  %v1410_v32 = vld [vmem:[%s1649_s3 + $0x38] sm:$0xff]  ;;  %v29_v35 = vld [vmem:[%s1648_s1 + $0x10] sm:$0xff]  ;;  %v1436_v46 = vld [vmem:[%s1649_s3 + $0x28] sm:$0xff] }
   0xb   :  { %304 = vperm.xlu1 %1164, %v42_v3   ;;  %v27_v50 = vld [vmem:[%s1648_s1] sm:$0xff] }
   0xc   :  { %v26_v52 = vld [vmem:[%s1650_s0] sm:$0x7] }
   0xd   :  { %v1454_v56 = vrot.slane %v26_v52, %v209_v51  ;;  %v1459_v58 = vrot.slane %v26_v52, %v125_v53  ;;  %v1465_v62 = vrot.slane %v26_v52, %v309_v57 }
   0xe   :  { %1171 = vset.pattern.permute.xlu0 %v1217_v1 }
   0xf   :  { %1165 = vset.pattern.permute.xlu1 %v1218_v7  ;;  %184 = vperm.xlu0 %1171, %v37_v6  }
  0x10   :  { %105 = vperm.xlu1 %1165, %v39_v4  }
  0x13   :  { %180 = vperm.xlu0 %1171, %v36_v8  }
  0x14   :  { %1166 = vset.pattern.permute.xlu1 %v1217_v1 }
  0x15   :  { %192 = vperm.xlu1 %1166, %v39_v4  }
  0x17   :  { %172 = vperm.xlu0 %1171, %v1281_v9  }
  0x19   :  { %196 = vperm.xlu1 %1166, %v40_v10  }
  0x1b   :  { %164 = vperm.xlu0 %1171, %v1290_v11  }
  0x1d   :  { %1167 = vset.pattern.permute.xlu1 %v1216_v0 }
  0x1e   :  { %296 = vperm.xlu1 %1167, %v40_v10  }
  0x1f   :  { %156 = vperm.xlu0 %1171, %v1296_v12  }
  0x22   :  { %1168 = vset.pattern.permute.xlu1 %v1218_v7 }
  0x23   :  { %431 = vperm.xlu1 %1168, %v1303_v13   ;;  %148 = vperm.xlu0 %1171, %v1308_v14  }
  0x27   :  { %95 = vperm.xlu1 %1168, %v37_v6   ;;  %1186 = vset.pattern.permute.xlu0 %v1218_v7 }
  0x28   :  { %115 = vperm.xlu0 %1186, %v41_v2  }
  0x2b   :  { %100 = vperm.xlu1 %1168, %v38_v5  }
  0x2c   :  { %120 = vperm.xlu0 %1186, %v42_v3  }
  0x2f   :  { %1169 = vset.pattern.permute.xlu1 %v1217_v1 }
  0x30   :  { %188 = vperm.xlu1 %1169, %v38_v5   ;;  %110 = vperm.xlu0 %1186, %v40_v10  }
  0x34   :  { %1170 = vset.pattern.permute.xlu1 %v1216_v0  ;;  %436 = vperm.xlu0 %1186, %v358_v15  }
  0x35   :  { %284 = vperm.xlu1 %1170, %v37_v6  }
  0x38   :  { %85 = vperm.xlu0 %1186, %v35_v16  }
  0x39   :  { %1172 = vset.pattern.permute.xlu1 %v1218_v7 }
  0x3a   :  { %421 = vperm.xlu1 %1172, %v1325_v17  }
  0x3c   :  { %411 = vperm.xlu0 %1186, %v353_v18  }
  0x3e   :  { %426 = vperm.xlu1 %1172, %v1335_v19  }
  0x40   :  { %80 = vperm.xlu0 %1186, %v1281_v9  }
  0x42   :  { %90 = vperm.xlu1 %1172, %v36_v8  }
  0x44   :  { %401 = vperm.xlu0 %1186, %v351_v20  }
  0x46   :  { %1173 = vset.pattern.permute.xlu1 %v1217_v1 }
  0x47   :  { %176 = vperm.xlu1 %1173, %v35_v16  }
  0x48   :  { %70 = vperm.xlu0 %1186, %v1290_v11  }
  0x4b   :  { %1174 = vset.pattern.permute.xlu1 %v1216_v0 }
  0x4c   :  { %276 = vperm.xlu1 %1174, %v35_v16   ;;  %391 = vperm.xlu0 %1186, %v1347_v21  }
  0x50   :  { %280 = vperm.xlu1 %1174, %v36_v8   ;;  %60 = vperm.xlu0 %1186, %v1296_v12  }
  0x54   :  { %1175 = vset.pattern.permute.xlu1 %v1218_v7  ;;  %381 = vperm.xlu0 %1186, %v1355_v22  }
  0x55   :  { %416 = vperm.xlu1 %1175, %v1360_v23  }
  0x58   :  { %50 = vperm.xlu0 %1186, %v1308_v14  }
  0x59   :  { %75 = vperm.xlu1 %1175, %v33_v24  }
  0x5c   :  { %371 = vperm.xlu0 %1186, %v1372_v25  }
  0x5d   :  { %1176 = vset.pattern.permute.xlu1 %v1217_v1 }
  0x5e   :  { %168 = vperm.xlu1 %1176, %v33_v24  }
  0x60   :  { %366 = vperm.xlu0 %1186, %v1379_v26  }
  0x62   :  { %1177 = vset.pattern.permute.xlu1 %v1216_v0 }
  0x63   :  { %268 = vperm.xlu1 %1177, %v33_v24  }
  0x64   :  { %1190 = vset.pattern.permute.xlu0 %v1217_v1 }
  0x65   :  { %556 = vperm.xlu0 %1190, %v358_v15  }
  0x67   :  { %272 = vperm.xlu1 %1177, %v1281_v9  }
  0x69   :  { %536 = vperm.xlu0 %1190, %v353_v18  }
  0x6b   :  { %1178 = vset.pattern.permute.xlu1 %v1218_v7 }
  0x6c   :  { %406 = vperm.xlu1 %1178, %v1388_v27  }
  0x6d   :  { %528 = vperm.xlu0 %1190, %v351_v20   ;;  %v1478_v20 = vld [vmem:[%s1649_s3 + $0x18] sm:$0xff] }
  0x70   :  { %65 = vperm.xlu1 %1178, %v31_v28  }
  0x71   :  { %520 = vperm.xlu0 %1190, %v1347_v21  }
  0x74   :  { %1179 = vset.pattern.permute.xlu1 %v1217_v1 }
  0x75   :  { %160 = vperm.xlu1 %1179, %v31_v28   ;;  %512 = vperm.xlu0 %1190, %v1355_v22  }
  0x79   :  { %1180 = vset.pattern.permute.xlu1 %v1216_v0  ;;  %504 = vperm.xlu0 %1190, %v1372_v25  }
  0x7a   :  { %260 = vperm.xlu1 %1180, %v31_v28  }
  0x7d   :  { %v201_v30 = vpop.permute.xlu1 %200  ;;  %v301_v31 = vpop.permute.xlu0 %300  ;;  %496 = vperm.xlu0 %1190, %v1403_v29  }
  0x7e   :  { %264 = vperm.xlu1 %1180, %v1290_v11   ;;  %v225_v61 = vmul.f32 %v1454_v56, %v201_v30  ;;  %v325_v2 = vmul.f32 %v1465_v62, %v301_v31 }
  0x81   :  { %v205_v33 = vpop.permute.xlu1 %204  ;;  %v1412_v34 = vpop.permute.xlu0 %292  ;;  %1193 = vset.pattern.permute.xlu0 %v1218_v7 }
  0x82   :  { %1181 = vset.pattern.permute.xlu1 %v1218_v7  ;;  %v226_v6 = vmul.f32 %v1454_v56, %v205_v33 }
  0x83   :  { %396 = vperm.xlu1 %1181, %v1410_v32  }
  0x85   :  { %v1420_v36 = vpop.permute.xlu0 %288 }
  0x86   :  { %v305_v37 = vpop.permute.xlu1 %304 }
  0x87   :  { %55 = vperm.xlu1 %1181, %v29_v35   ;;  %v326_v15 = vmul.f32 %v1465_v62, %v305_v37 }
  0x8a   :  { %v1422_v38 = vpop.permute.xlu0 %184 }
  0x8b   :  { %v106_v39 = vpop.permute.xlu1 %105  ;;  %1182 = vset.pattern.permute.xlu1 %v1217_v1 }
  0x8c   :  { %152 = vperm.xlu1 %1182, %v29_v35   ;;  %v139_v30 = vmul.f32 %v1459_v58, %v106_v39 }
  0x8e   :  { %v1425_v40 = vpop.permute.xlu0 %180 }
  0x90   :  { %v193_v41 = vpop.permute.xlu1 %192  ;;  %1183 = vset.pattern.permute.xlu1 %v1216_v0 }
  0x91   :  { %252 = vperm.xlu1 %1183, %v29_v35   ;;  %v223_v16 = vmul.f32 %v1454_v56, %v193_v41 }
  0x92   :  { %v1428_v42 = vpop.permute.xlu0 %172 }
  0x93   :  { %v239_v37 = vadd.f32 %v223_v16, %v139_v30 }
  0x94   :  { %v197_v44 = vpop.permute.xlu1 %196 }
  0x95   :  { %256 = vperm.xlu1 %1183, %v1296_v12   ;;  %v224_v41 = vmul.f32 %v1454_v56, %v197_v44 }
  0x96   :  { %v1431_v45 = vpop.permute.xlu0 %164 }
  0x99   :  { %v297_v48 = vpop.permute.xlu1 %296  ;;  %1184 = vset.pattern.permute.xlu1 %v1218_v7 }
  0x9a   :  { %386 = vperm.xlu1 %1184, %v1436_v46   ;;  %v1442_v49 = vpop.permute.xlu0 %156  ;;  %v324_v39 = vmul.f32 %v1465_v62, %v297_v48 }
  0x9e   :  { %v432_v54 = vpop.permute.xlu1 %431  ;;  %45 = vperm.xlu1 %1184, %v27_v50   ;;  %v1452_v55 = vpop.permute.xlu0 %148 }
  0xa2   :  { %v1461_v59 = vpop.permute.xlu1 %95  ;;  %1185 = vset.pattern.permute.xlu1 %v1217_v1 }
  0xa3   :  { %v116_v60 = vpop.permute.xlu0 %115  ;;  %144 = vperm.xlu1 %1185, %v27_v50  }
  0xa4   :  { %v141_v63 = vmul.f32 %v1459_v58, %v116_v60 }
  0xa6   :  { %v241_v3 = vadd.f32 %v225_v61, %v141_v63  ;;  %v101_v4 = vpop.permute.xlu1 %100 }
  0xa7   :  { %v121_v5 = vpop.permute.xlu0 %120  ;;  %1187 = vset.pattern.permute.xlu1 %v1216_v0 }
  0xa8   :  { %v142_v8 = vmul.f32 %v1459_v58, %v121_v5  ;;  %244 = vperm.xlu1 %1187, %v27_v50   ;;  %v341_v9 = vadd.f32 %v325_v2, %v241_v3 }
  0xaa   :  { %v242_v10 = vadd.f32 %v226_v6, %v142_v8  ;;  %v453_v24 = vadd.f32 %v432_v54, %v341_v9 }
  0xab   :  { %v189_v11 = vpop.permute.xlu1 %188  ;;  %v111_v12 = vpop.permute.xlu0 %110 }
  0xac   :  { %248 = vperm.xlu1 %1187, %v1308_v14   ;;  %v342_v18 = vadd.f32 %v326_v15, %v242_v10  ;;  %v140_v31 = vmul.f32 %v1459_v58, %v111_v12  ;;  %v323_v14 = vmul.f32 %v1465_v62, %v1412_v34  ;;  %v469_v50 = vmax.f32 %v453_v24, 0.0  ;;  %v1200_v34 = vld [vmem:[%s1651_s2] sm:$0xff]  }
  0xad   :  { %1111 = vmatprep.mubr.bf16.mxu0 %v1200_v34  ;;  %v222_v9 = vmul.f32 %v1454_v56, %v189_v11  ;;  %v138_v12 = vmul.f32 %v1459_v58, %v101_v4 }
  0xae   :  { %v240_v51 = vadd.f32 %v224_v41, %v140_v31  ;;  %v339_v57 = vadd.f32 %v323_v14, %v239_v37 }
  0xaf   :  { %v437_v28 = vpop.permute.xlu0 %436 }
  0xb0   :  { %v454_v33 = vadd.f32 %v437_v28, %v342_v18  ;;  %v285_v35 = vpop.permute.xlu1 %284  ;;  %1188 = vset.pattern.permute.xlu1 %v1218_v7  ;;  %v340_v61 = vadd.f32 %v324_v39, %v240_v51 }
  0xb1   :  { %376 = vperm.xlu1 %1188, %v1478_v20  }
  0xb2   :  { %v470_v43 = vmax.f32 %v454_v33, 0.0 }
  0xb3   :  { %v86_v8 = vpop.permute.xlu0 %85 }
  0xb4   :  { %v494_v52 = vpack.c.bf16 %v470_v43, %v469_v50  ;;  %v135_v33 = vmul.f32 %v1459_v58, %v86_v8  ;;  %v220_v43 = vmul.f32 %v1454_v56, %v1425_v40 }
  0xb5   :  { %v422_v54 = vpop.permute.xlu1 %421  ;;  %361 = vperm.xlu1 %1188, %v1403_v29  }
  0xb6   :  { %1095 = vmatprep.subr.bf16.mxu0 %v494_v52  ;;  %v451_v60 = vadd.f32 %v422_v54, %v339_v57 }
  0xb7   :  { %1096 = vmatpush3.bf16.msra.mxu0 %v494_v52  ;;  %v412_v18 = vpop.permute.xlu0 %411 }
  0xb8   :  { %v467_v2 = vmax.f32 %v451_v60, 0.0 }
  0xb9   :  { %v427_v63 = vpop.permute.xlu1 %426  ;;  %1189 = vset.pattern.permute.xlu1 %v1217_v1  ;;  %v221_v1 = vmul.f32 %v1454_v56, %v1422_v38 }
  0xba   :  { %v452_v44 = vadd.f32 %v427_v63, %v340_v61  ;;  %552 = vperm.xlu1 %1189, %v1303_v13   ;;  %v137_v13 = vmul.f32 %v1459_v58, %v1461_v59 }
  0xbb   :  { %v81_v14 = vpop.permute.xlu0 %80 }
  0xbc   :  { %v468_v3 = vmax.f32 %v452_v44, 0.0  ;;  %v237_v15 = vadd.f32 %v221_v1, %v137_v13 }
  0xbd   :  { %v91_v5 = vpop.permute.xlu1 %90 }
  0xbe   :  { %v493_v48 = vpack.c.bf16 %v468_v3, %v467_v2  ;;  %544 = vperm.xlu1 %1189, %v1325_v17   ;;  %v321_v17 = vmul.f32 %v1465_v62, %v285_v35  ;;  %v136_v50 = vmul.f32 %v1459_v58, %v91_v5 }
  0xbf   :  { %v402_v57 = vpop.permute.xlu0 %401 }
  0xc0   :  { %1097 = vmatprep.subr.bf16.mxu0 %v493_v48  ;;  %v337_v38 = vadd.f32 %v321_v17, %v237_v15  ;;  %v236_v60 = vadd.f32 %v220_v43, %v136_v50 }
  0xc1   :  { %1098 = vmatpush3.bf16.msra.mxu0 %v493_v48 }
  0xc2   :  { %v177_v6 = vpop.permute.xlu1 %176  ;;  %548 = vperm.xlu1 %1189, %v1335_v19   ;;  %v322_v19 = vmul.f32 %v1465_v62, %v1420_v36  ;;  %v449_v59 = vadd.f32 %v412_v18, %v337_v38 }
  0xc3   :  { %v219_v35 = vmul.f32 %v1454_v56, %v177_v6  ;;  %v218_v6 = vmul.f32 %v1454_v56, %v1428_v42 }
  0xc4   :  { %v465_v4 = vmax.f32 %v449_v59, 0.0 }
  0xc5   :  { %v235_v51 = vadd.f32 %v219_v35, %v135_v33  ;;  %v216_v35 = vmul.f32 %v1454_v56, %v1431_v45 }
  0xc6   :  { %540 = vperm.xlu1 %1189, %v1360_v23   ;;  %v238_v23 = vadd.f32 %v222_v9, %v138_v12  ;;  %v71_v9 = vpop.permute.xlu0 %70 }
  0xc7   :  { %v277_v10 = vpop.permute.xlu1 %276 }
  0xc8   :  { %v338_v24 = vadd.f32 %v322_v19, %v238_v23  ;;  %v319_v37 = vmul.f32 %v1465_v62, %v277_v10 }
  0xca   :  { %532 = vperm.xlu1 %1189, %v1388_v27   ;;  %v335_v54 = vadd.f32 %v319_v37, %v235_v51  ;;  %v392_v23 = vpop.permute.xlu0 %391 }
  0xcb   :  { %v281_v16 = vpop.permute.xlu1 %280 }
  0xcc   :  { %v320_v52 = vmul.f32 %v1465_v62, %v281_v16  ;;  %v447_v61 = vadd.f32 %v402_v57, %v335_v54 }
  0xce   :  { %524 = vperm.xlu1 %1189, %v1410_v32   ;;  %v336_v34 = vadd.f32 %v320_v52, %v236_v60  ;;  %v463_v44 = vmax.f32 %v447_v61, 0.0  ;;  %v61_v33 = vpop.permute.xlu0 %60 }
  0xd0   :  { %v417_v11 = vpop.permute.xlu1 %416 }
  0xd1   :  { %v450_v28 = vadd.f32 %v417_v11, %v338_v24 }
  0xd2   :  { %516 = vperm.xlu1 %1189, %v1436_v46   ;;  %v382_v52 = vpop.permute.xlu0 %381 }
  0xd3   :  { %v466_v30 = vmax.f32 %v450_v28, 0.0 }
  0xd4   :  { %v76_v31 = vpop.permute.xlu1 %75 }
  0xd5   :  { %v492_v27 = vpack.c.bf16 %v466_v30, %v465_v4  ;;  %v133_v8 = vmul.f32 %v1459_v58, %v76_v31 }
  0xd6   :  { %508 = vperm.xlu1 %1189, %v1478_v20  }
  0xd7   :  { %1099 = vmatprep.subr.bf16.mxu0 %v492_v27 }
  0xd8   :  { %1100 = vmatpush3.bf16.msra.mxu0 %v492_v27 }
  0xd9   :  { %v169_v36 = vpop.permute.xlu1 %168 }
  0xda   :  { %500 = vperm.xlu1 %1189, %v1379_v26   ;;  %v217_v48 = vmul.f32 %v1454_v56, %v169_v36 }
  0xdc   :  { %v233_v10 = vadd.f32 %v217_v48, %v133_v8  ;;  %v130_v8 = vmul.f32 %v1459_v58, %v61_v33 }
  0xde   :  { %v269_v41 = vpop.permute.xlu1 %268  ;;  %1191 = vset.pattern.permute.xlu1 %v1216_v0 }
  0xdf   :  { %750 = vperm.xlu1 %1191, %v1379_v26   ;;  %v317_v1 = vmul.f32 %v1465_v62, %v269_v41 }
  0xe1   :  { %v333_v17 = vadd.f32 %v317_v1, %v233_v10 }
  0xe2   :  { %v273_v39 = vpop.permute.xlu1 %272 }
  0xe3   :  { %754 = vperm.xlu1 %1191, %v1372_v25   ;;  %v134_v25 = vmul.f32 %v1459_v58, %v81_v14  ;;  %v318_v19 = vmul.f32 %v1465_v62, %v273_v39  ;;  %v445_v16 = vadd.f32 %v392_v23, %v333_v17  ;;  %v132_v14 = vmul.f32 %v1459_v58, %v71_v9 }
  0xe5   :  { %v234_v12 = vadd.f32 %v218_v6, %v134_v25  ;;  %v461_v42 = vmax.f32 %v445_v16, 0.0  ;;  %v232_v51 = vadd.f32 %v216_v35, %v132_v14  ;;  %v214_v6 = vmul.f32 %v1454_v56, %v1442_v49  ;;  %v1202_v14 = vld [vmem:[%s1651_s2 + $0x10] sm:$0xff]  }
  0xe6   :  { %v212_v25 = vmul.f32 %v1454_v56, %v1452_v55 }
  0xe7   :  { %v407_v63 = vpop.permute.xlu1 %406  ;;  %1192 = vset.pattern.permute.xlu1 %v1218_v7  ;;  %v334_v18 = vadd.f32 %v318_v19, %v234_v12  ;;  %v230_v19 = vadd.f32 %v214_v6, %v130_v8 }
  0xe8   :  { %v448_v26 = vadd.f32 %v407_v63, %v336_v34 }
  0xea   :  { %v464_v2 = vmax.f32 %v448_v26, 0.0 }
  0xeb   :  { %v66_v40 = vpop.permute.xlu1 %65 }
  0xec   :  { %v491_v3 = vpack.c.bf16 %v464_v2, %v463_v44  ;;  %v131_v31 = vmul.f32 %v1459_v58, %v66_v40  ;;  %v51_v2 = vpop.permute.xlu0 %50 }
  0xed   :  { %v128_v1 = vmul.f32 %v1459_v58, %v51_v2 }
  0xee   :  { %1101 = vmatprep.subr.bf16.mxu0 %v491_v3 }
  0xef   :  { %1102 = vmatpush3.bf16.msra.mxu0 %v491_v3 }
  0xf0   :  { %v161_v5 = vpop.permute.xlu1 %160  ;;  %v372_v12 = vpop.permute.xlu0 %371 }
  0xf1   :  { %v215_v30 = vmul.f32 %v1454_v56, %v161_v5 }
  0xf3   :  { %v231_v37 = vadd.f32 %v215_v30, %v131_v31 }
  0xf5   :  { %v261_v13 = vpop.permute.xlu1 %260 }
  0xf6   :  { %v315_v27 = vmul.f32 %v1465_v62, %v261_v13 }
  0xf8   :  { %v331_v41 = vadd.f32 %v315_v27, %v231_v37  ;;  %v1203_v37 = vld [vmem:[%s1651_s2 + $0x18] sm:$0xff]  }
  0xf9   :  { %v265_v15 = vpop.permute.xlu1 %264 }
  0xfa   :  { %v316_v43 = vmul.f32 %v1465_v62, %v265_v15  ;;  %v443_v54 = vadd.f32 %v382_v52, %v331_v41  ;;  %v228_v15 = vadd.f32 %v212_v25, %v128_v1  ;;  %v1204_v41 = vld [vmem:[%s1651_s2 + $0x20] sm:$0xff]  }
  0xfb   :  { %v1208_v52 = vld [vmem:[%s1651_s2 + $0x40] sm:$0xff]  }
  0xfc   :  { %v332_v39 = vadd.f32 %v316_v43, %v232_v51  ;;  %v459_v61 = vmax.f32 %v443_v54, 0.0  ;;  %v1205_v43 = vld [vmem:[%s1651_s2 + $0x28] sm:$0xff]   ;;  %v1207_v51 = vld [vmem:[%s1651_s2 + $0x38] sm:$0xff]   ;;  %1143 = vmatprep.mubr.bf16.mxu1 %v1208_v52  ;;  %v946_v54 = vld [vmem:[%s1652_s4] sm:$0xff] }
  0xfd   :  { %956 = vperm.xlu1 %1192, %v946_v54  }
  0xfe   :  { %v397_v38 = vpop.permute.xlu1 %396 }
  0xff   :  { %v446_v59 = vadd.f32 %v397_v38, %v334_v18 }
 0x101   :  { %v462_v24 = vmax.f32 %v446_v59, 0.0  ;;  %1195 = vset.pattern.permute.xlu1 %v1216_v0 }
 0x102   :  { %v56_v11 = vpop.permute.xlu1 %55  ;;  %762 = vperm.xlu1 %1195, %v1355_v22   ;;  %v950_v22 = vld [vmem:[%s1652_s4 + $0x20] sm:$0xff] }
 0x103   :  { %v490_v28 = vpack.c.bf16 %v462_v24, %v461_v42  ;;  %v129_v40 = vmul.f32 %v1459_v58, %v56_v11  ;;  %v367_v11 = vpop.permute.xlu0 %366 }
 0x105   :  { %1103 = vmatprep.subr.bf16.mxu0 %v490_v28 }
 0x106   :  { %1104 = vmatpush3.bf16.msra.mxu0 %v490_v28  ;;  %1196 = vset.pattern.permute.xlu1 %v1218_v7 }
 0x107   :  { %v153_v4 = vpop.permute.xlu1 %152 }
 0x108   :  { %v213_v44 = vmul.f32 %v1454_v56, %v153_v4 }
 0x10a   :  { %v229_v48 = vadd.f32 %v213_v44, %v129_v40 }
 0x10c   :  { %v253_v36 = vpop.permute.xlu1 %252 }
 0x10d   :  { %v313_v3 = vmul.f32 %v1465_v62, %v253_v36 }
 0x10f   :  { %v329_v13 = vadd.f32 %v313_v3, %v229_v48 }
 0x110   :  { %v257_v50 = vpop.permute.xlu1 %256 }
 0x111   :  { %v314_v9 = vmul.f32 %v1465_v62, %v257_v50  ;;  %v441_v16 = vadd.f32 %v372_v12, %v329_v13  ;;  %v1206_v50 = vld [vmem:[%s1651_s2 + $0x30] sm:$0xff]  }
 0x113   :  { %v330_v38 = vadd.f32 %v314_v9, %v230_v19  ;;  %v457_v4 = vmax.f32 %v441_v16, 0.0 }
 0x115   :  { %v387_v57 = vpop.permute.xlu1 %386 }
 0x116   :  { %v444_v60 = vadd.f32 %v387_v57, %v332_v39  ;;  %v947_v39 = vld [vmem:[%s1652_s4 + $0x8] sm:$0xff]  ;;  %v11_v57 = vstv %s1653_s5 }
 0x117   :  { %961 = vperm.xlu0 %1193, %v947_v39   ;;  %12 = vst [vmem:[#allocation2] sm:$0x1] %v11_v57 }
 0x118   :  { %v460_v34 = vmax.f32 %v444_v60, 0.0  ;;  %v948_v60 = vld [vmem:[%s1652_s4 + $0x10] sm:$0xff] }
 0x119   :  { %v46_v63 = vpop.permute.xlu1 %45  ;;  %966 = vperm.xlu1 %1196, %v948_v60  }
 0x11a   :  { %v489_v26 = vpack.c.bf16 %v460_v34, %v459_v61  ;;  %v127_v49 = vmul.f32 %v1459_v58, %v46_v63  ;;  %v949_v61 = vld [vmem:[%s1652_s4 + $0x18] sm:$0xff] }
 0x11b   :  { %1194 = vset.pattern.permute.xlu0 %v1216_v0 }
 0x11c   :  { %1105 = vmatprep.subr.bf16.mxu0 %v489_v26  ;;  %746 = vperm.xlu0 %1194, %v1403_v29   ;;  %v952_v29 = vld [vmem:[%s1652_s4 + $0x30] sm:$0xff] }
 0x11d   :  { %1106 = vmatpush3.bf16.msra.mxu0 %v489_v26  ;;  %971 = vperm.xlu1 %1196, %v949_v61  }
 0x11e   :  { %v145_v45 = vpop.permute.xlu1 %144 }
 0x11f   :  { %v211_v23 = vmul.f32 %v1454_v56, %v145_v45 }
 0x120   :  { %758 = vperm.xlu0 %1194, %v1478_v20   ;;  %v951_v20 = vld [vmem:[%s1652_s4 + $0x28] sm:$0xff] }
 0x121   :  { %v227_v42 = vadd.f32 %v211_v23, %v127_v49  ;;  %1197 = vset.pattern.permute.xlu1 %v1216_v0  ;;  %v953_v0 = vld [vmem:[%s1652_s4 + $0x38] sm:$0xff] }
 0x122   :  { %770 = vperm.xlu1 %1197, %v1347_v21  }
 0x123   :  { %v245_v5 = vpop.permute.xlu1 %244 }
 0x124   :  { %v311_v55 = vmul.f32 %v1465_v62, %v245_v5  ;;  %766 = vperm.xlu0 %1194, %v1436_v46   ;;  %v1015_v46 = vld [vmem:[#allocation2] sm:$0x1] }
 0x126   :  { %v327_v31 = vadd.f32 %v311_v55, %v227_v42  ;;  %774 = vperm.xlu1 %1197, %v1410_v32  }
 0x127   :  { %v249_v10 = vpop.permute.xlu1 %248 }
 0x128   :  { %v312_v17 = vmul.f32 %v1465_v62, %v249_v10  ;;  %v1201_v62 = vld [vmem:[%s1651_s2 + $0x8] sm:$0xff]   ;;  %1198 = vset.pattern.permute.xlu0 %v1218_v7 }
 0x129   :  { %976 = vperm.xlu0 %1198, %v950_v22  }
 0x12a   :  { %v328_v18 = vadd.f32 %v312_v17, %v228_v15  ;;  %1199 = vset.pattern.permute.xlu1 %v1218_v7  ;;  %v557_v7 = vpop.permute.xlu0 %556 }
 0x12b   :  { %981 = vperm.xlu1 %1199, %v951_v20  }
 0x12c   :  { %v377_v59 = vpop.permute.xlu1 %376  ;;  %v440_v28 = vadd.f32 %v367_v11, %v328_v18 }
 0x12d   :  { %v442_v24 = vadd.f32 %v377_v59, %v330_v38  ;;  %986 = vperm.xlu0 %1198, %v952_v29  }
 0x12e   :  { %v456_v56 = vmax.f32 %v440_v28, 0.0  ;;  %v537_v8 = vpop.permute.xlu0 %536 }
 0x12f   :  { %v458_v30 = vmax.f32 %v442_v24, 0.0  ;;  %991 = vperm.xlu1 %1199, %v953_v0  }
 0x130   :  { %v362_v27 = vpop.permute.xlu1 %361 }
 0x131   :  { %v488_v36 = vpack.c.bf16 %v458_v30, %v457_v4  ;;  %v439_v33 = vadd.f32 %v362_v27, %v327_v31  ;;  %1018 = vperm.xlu0 %1198, %v1015_v46  }
 0x132   :  { %v529_v12 = vpop.permute.xlu0 %528 }
 0x133   :  { %v455_v35 = vmax.f32 %v439_v33, 0.0  ;;  %1107 = vmatprep.subr.bf16.mxu0 %v488_v36 }
 0x134   :  { %1108 = vmatpush3.bf16.msra.mxu0 %v488_v36 }
 0x135   :  { %v487_v58 = vpack.c.bf16 %v456_v56, %v455_v35  ;;  %v553_v21 = vpop.permute.xlu1 %552 }
 0x136   :  { %v521_v24 = vpop.permute.xlu0 %520 }
 0x137   :  { %1109 = vmatprep.subr.bf16.mxu0 %v487_v58 }
 0x138   :  { %1110 = vmatpush3.bf16.msra.mxu0 %v487_v58 }
 0x139   :  { %v545_v26 = vpop.permute.xlu1 %544 }
 0x13a   :  { %v513_v58 = vpop.permute.xlu0 %512 }
 0x13b   :  { %1112 = vmatmul.mubr.bf16.vlgmr.msra.gmra.mxu0 %v1201_v62 }
 0x13c   :  { %1115 = vmatprep.mubr.bf16.mxu0 %v1202_v14 }
 0x13d   :  { %v549_v40 = vpop.permute.xlu1 %548 }
 0x13e   :  { %v505_v39 = vpop.permute.xlu0 %504 }
 0x141   :  { %v541_v6 = vpop.permute.xlu1 %540 }
 0x143   :  { %1116 = vmatmul.mubr.bf16.gmra.mxu0 %v1203_v37 }
 0x144   :  { %1119 = vmatprep.mubr.bf16.mxu0 %v1204_v41 }
 0x145   :  { %v533_v9 = vpop.permute.xlu1 %532 }
 0x149   :  { %v525_v49 = vpop.permute.xlu1 %524 }
 0x14b   :  { %1120 = vmatmul.mubr.bf16.gmra.mxu0 %v1205_v43 }
 0x14c   :  { %1123 = vmatprep.mubr.bf16.mxu0 %v1206_v50 }
 0x14d   :  { %v517_v33 = vpop.permute.xlu1 %516 }
 0x151   :  { %v509_v50 = vpop.permute.xlu1 %508 }
 0x153   :  { %1124 = vmatmul.mubr.bf16.gmra.mxu0 %v1207_v51 }
 0x155   :  { %v501_v46 = vpop.permute.xlu1 %500 }
 0x1fb   :  { %v1613_v34 = vpop.f32.mrf.mxu0 }
 0x1fc   :  { %v650_v20 = vadd.f32 %v1613_v34, %v505_v39  ;;  %v1209_v34 = vld [vmem:[%s1651_s2 + $0x48] sm:$0xff]  }
 0x1fd   :  { %v1615_v63 = vpop.f32.mrf.mxu0 }
 0x1ff   :  { %v1114_v32 = vpop.f32.mrf.mxu0 }
 0x200   :  { %v653_v61 = vadd.f32 %v1114_v32, %v509_v50 }
 0x201   :  { %v1617_v45 = vpop.f32.mrf.mxu0 }
 0x203   :  { %v1117_v44 = vpop.f32.mrf.mxu0 }
 0x204   :  { %v666_v41 = vadd.f32 %v1117_v44, %v521_v24  ;;  %v645_v44 = vadd.f32 %v1617_v45, %v501_v46  ;;  %v1210_v45 = vld [vmem:[%s1651_s2 + $0x50] sm:$0xff]  }
 0x205   :  { %v657_v2 = vpop.f32.mrf.mxu0 }
 0x206   :  { %v710_v57 = vmax.f32 %v666_v41, 0.0  ;;  %v658_v60 = vadd.f32 %v657_v2, %v513_v58  ;;  %v705_v32 = vmax.f32 %v645_v44, 0.0 }
 0x207   :  { %v1118_v3 = vpop.f32.mrf.mxu0 }
 0x208   :  { %v669_v62 = vadd.f32 %v1118_v3, %v525_v49  ;;  %v708_v0 = vmax.f32 %v658_v60, 0.0  ;;  %v706_v3 = vmax.f32 %v650_v20, 0.0 }
 0x209   :  { %v660_v5 = vpop.f32.mrf.mxu0 }
 0x20a   :  { %v711_v51 = vmax.f32 %v669_v62, 0.0  ;;  %v661_v52 = vadd.f32 %v660_v5, %v517_v33 }
 0x20b   :  { %v1121_v48 = vpop.f32.mrf.mxu0 }
 0x20c   :  { %v682_v11 = vadd.f32 %v1121_v48, %v537_v8  ;;  %v740_v22 = vpack.c.bf16 %v711_v51, %v710_v57  ;;  %v709_v29 = vmax.f32 %v661_v52, 0.0  ;;  %v1214_v8 = vld [vmem:[%s1651_s2 + $0x70] sm:$0xff]  }
 0x20d   :  { %v673_v25 = vpop.f32.mrf.mxu0 }
 0x20e   :  { %v714_v35 = vmax.f32 %v682_v11, 0.0  ;;  %v674_v56 = vadd.f32 %v673_v25, %v529_v12  ;;  %v1213_v25 = vld [vmem:[%s1651_s2 + $0x68] sm:$0xff]  }
 0x20f   :  { %v1122_v1 = vpop.f32.mrf.mxu0 }
 0x210   :  { %v685_v18 = vadd.f32 %v1122_v1, %v541_v6  ;;  %v712_v43 = vmax.f32 %v674_v56, 0.0  ;;  %v1212_v6 = vld [vmem:[%s1651_s2 + $0x60] sm:$0xff]   ;;  %v1215_v1 = vld [vmem:[%s1651_s2 + $0x78] sm:$0xff]  }
 0x211   :  { %v676_v13 = vpop.f32.mrf.mxu0 }
 0x212   :  { %v715_v31 = vmax.f32 %v685_v18, 0.0  ;;  %v677_v27 = vadd.f32 %v676_v13, %v533_v9  ;;  %v751_v13 = vpop.permute.xlu1 %750 }
 0x213   :  { %v1125_v10 = vpop.f32.mrf.mxu0 }
 0x214   :  { %v698_v19 = vadd.f32 %v1125_v10, %v553_v21  ;;  %v742_v14 = vpack.c.bf16 %v715_v31, %v714_v35  ;;  %v713_v37 = vmax.f32 %v677_v27, 0.0  ;;  %v497_v21 = vpop.permute.xlu0 %496 }
 0x215   :  { %v689_v17 = vpop.f32.mrf.mxu0 }
 0x216   :  { %v690_v23 = vadd.f32 %v689_v17, %v545_v26  ;;  %v718_v38 = vmax.f32 %v698_v19, 0.0  ;;  %v741_v54 = vpack.c.bf16 %v713_v37, %v712_v43  ;;  %v707_v26 = vmax.f32 %v653_v61, 0.0  ;;  %v755_v9 = vpop.permute.xlu1 %754 }
 0x217   :  { %v1126_v15 = vpop.f32.mrf.mxu0 }
 0x218   :  { %v701_v16 = vadd.f32 %v1126_v15, %v557_v7  ;;  %v716_v28 = vmax.f32 %v690_v23, 0.0  ;;  %v642_v7 = vadd.f32 %v1615_v63, %v497_v21  ;;  %v738_v2 = vpack.c.bf16 %v707_v26, %v706_v3  ;;  %v1211_v63 = vld [vmem:[%s1651_s2 + $0x58] sm:$0xff]   ;;  %v962_v17 = vpop.permute.xlu0 %961 }
 0x219   :  { %v692_v55 = vpop.f32.mrf.mxu0 }
 0x21a   :  { %v719_v59 = vmax.f32 %v701_v16, 0.0  ;;  %v693_v42 = vadd.f32 %v692_v55, %v549_v40  ;;  %v739_v40 = vpack.c.bf16 %v709_v29, %v708_v0  ;;  %v704_v5 = vmax.f32 %v642_v7, 0.0  ;;  %v957_v10 = vpop.permute.xlu1 %956 }
 0x21c   :  { %v717_v4 = vmax.f32 %v693_v42, 0.0  ;;  %v744_v30 = vpack.c.bf16 %v719_v59, %v718_v38  ;;  %v737_v48 = vpack.c.bf16 %v705_v32, %v704_v5  ;;  %v747_v15 = vpop.permute.xlu0 %746 }
 0x21e   :  { %v743_v36 = vpack.c.bf16 %v717_v4, %v716_v28  ;;  %1127 = vmatprep.subr.bf16.mxu1 %v744_v30  ;;  %v763_v12 = vpop.permute.xlu1 %762 }
 0x21f   :  { %1128 = vmatpush3.bf16.msra.mxu1 %v744_v30 }
 0x220   :  { %1129 = vmatprep.subr.bf16.mxu1 %v743_v36  ;;  %v759_v16 = vpop.permute.xlu0 %758 }
 0x222   :  { %v967_v19 = vpop.permute.xlu1 %966 }
 0x223   :  { %1130 = vmatpush3.bf16.msra.mxu1 %v743_v36 }
 0x224   :  { %1131 = vmatprep.subr.bf16.mxu1 %v742_v14  ;;  %v767_v24 = vpop.permute.xlu0 %766 }
 0x226   :  { %v972_v23 = vpop.permute.xlu1 %971 }
 0x227   :  { %1132 = vmatpush3.bf16.msra.mxu1 %v742_v14 }
 0x228   :  { %1133 = vmatprep.subr.bf16.mxu1 %v741_v54  ;;  %v977_v37 = vpop.permute.xlu0 %976 }
 0x22a   :  { %v771_v18 = vpop.permute.xlu1 %770 }
 0x22b   :  { %1134 = vmatpush3.bf16.msra.mxu1 %v741_v54 }
 0x22c   :  { %1135 = vmatprep.subr.bf16.mxu1 %v740_v22  ;;  %v987_v26 = vpop.permute.xlu0 %986 }
 0x22e   :  { %v775_v31 = vpop.permute.xlu1 %774 }
 0x22f   :  { %1136 = vmatpush3.bf16.msra.mxu1 %v740_v22 }
 0x230   :  { %1137 = vmatprep.subr.bf16.mxu1 %v739_v40 }
 0x232   :  { %v982_v54 = vpop.permute.xlu1 %981 }
 0x233   :  { %1138 = vmatpush3.bf16.msra.mxu1 %v739_v40 }
 0x234   :  { %1139 = vmatprep.subr.bf16.mxu1 %v738_v2 }
 0x237   :  { %1140 = vmatpush3.bf16.msra.mxu1 %v738_v2  ;;  %v992_v2 = vpop.permute.xlu1 %991 }
 0x238   :  { %1141 = vmatprep.subr.bf16.mxu1 %v737_v48 }
 0x23b   :  { %1142 = vmatpush3.bf16.msra.mxu1 %v737_v48 }
 0x23e   :  { %1144 = vmatmul.mubr.bf16.vlgmr.msra.gmra.mxu1 %v1209_v34 }
 0x23f   :  { %1147 = vmatprep.mubr.bf16.mxu1 %v1210_v45 }
 0x246   :  { %1148 = vmatmul.mubr.bf16.gmra.mxu1 %v1211_v63 }
 0x247   :  { %1151 = vmatprep.mubr.bf16.mxu1 %v1212_v6 }
 0x24e   :  { %1152 = vmatmul.mubr.bf16.gmra.mxu1 %v1213_v25 }
 0x24f   :  { %1155 = vmatprep.mubr.bf16.mxu1 %v1214_v8 }
 0x256   :  { %1156 = vmatmul.mubr.bf16.gmra.mxu1 %v1215_v1 }
 0x2fe   :  { %v1145_v49 = vpop.f32.mrf.mxu1 }
 0x2ff   :  { %v892_v42 = vadd.f32 %v1145_v49, %v755_v9 }
 0x300   :  { %v883_v55 = vpop.f32.mrf.mxu1 }
 0x301   :  { %v884_v38 = vadd.f32 %v883_v55, %v747_v15  ;;  %v940_v36 = vmax.f32 %v892_v42, 0.0 }
 0x302   :  { %v1146_v59 = vpop.f32.mrf.mxu1 }
 0x303   :  { %v938_v28 = vmax.f32 %v884_v38, 0.0  ;;  %v895_v4 = vadd.f32 %v1146_v59, %v759_v16  ;;  %v996_v43 = vmul.f32 %v967_v19, %v940_v36  ;;  %v1019_v19 = vpop.permute.xlu0 %1018 }
 0x304   :  { %v886_v11 = vpop.f32.mrf.mxu1 }
 0x305   :  { %v887_v30 = vadd.f32 %v886_v11, %v751_v13  ;;  %v994_v56 = vmul.f32 %v957_v10, %v938_v28  ;;  %v941_v58 = vmax.f32 %v895_v4, 0.0 }
 0x306   :  { %v1149_v27 = vpop.f32.mrf.mxu1 }
 0x307   :  { %v939_v33 = vmax.f32 %v887_v30, 0.0  ;;  %v908_v51 = vadd.f32 %v1149_v27, %v771_v18  ;;  %v997_v57 = vmul.f32 %v972_v23, %v941_v58  ;;  %v1024_v23 = vrot.slane %v1019_v19, %v125_v53 }
 0x308   :  { %v899_v35 = vpop.f32.mrf.mxu1 }
 0x309   :  { %v995_v62 = vmul.f32 %v962_v17, %v939_v33  ;;  %v900_v14 = vadd.f32 %v899_v35, %v763_v12  ;;  %v944_v46 = vmax.f32 %v908_v51, 0.0 }
 0x30a   :  { %v1150_v41 = vpop.f32.mrf.mxu1 }
 0x30b   :  { %v1002_v50 = vadd.f32 %v995_v62, %v994_v56  ;;  %v942_v52 = vmax.f32 %v900_v14, 0.0  ;;  %v911_v61 = vadd.f32 %v1150_v41, %v775_v31  ;;  %v1000_v5 = vmul.f32 %v987_v26, %v944_v46 }
 0x30c   :  { %v902_v39 = vpop.f32.mrf.mxu1 }
 0x30d   :  { %v1003_v60 = vadd.f32 %v1002_v50, %v996_v43  ;;  %v903_v22 = vadd.f32 %v902_v39, %v767_v24  ;;  %v998_v20 = vmul.f32 %v977_v37, %v942_v52  ;;  %v945_v3 = vmax.f32 %v911_v61, 0.0 }
 0x30e   :  { %v1153_v29 = vpop.f32.mrf.mxu1 }
 0x30f   :  { %v1004_v0 = vadd.f32 %v1003_v60, %v997_v57  ;;  %v943_v21 = vmax.f32 %v903_v22, 0.0  ;;  %v1001_v45 = vmul.f32 %v992_v2, %v945_v3 }
 0x310   :  { %v915_v44 = vpop.f32.mrf.mxu1 }
 0x311   :  { %v1005_v40 = vadd.f32 %v1004_v0, %v998_v20  ;;  %v999_v7 = vmul.f32 %v982_v54, %v943_v21 }
 0x312   :  { %v1154_v32 = vpop.f32.mrf.mxu1 }
 0x313   :  { %v1006_v48 = vadd.f32 %v1005_v40, %v999_v7 }
 0x314   :  { %v917_v34 = vpop.f32.mrf.mxu1 }
 0x315   :  { %v1007_v63 = vadd.f32 %v1006_v48, %v1000_v5 }
 0x316   :  { %v1157_v6 = vpop.f32.mrf.mxu1 }
 0x317   :  { %v1008_v25 = vadd.f32 %v1007_v63, %v1001_v45 }
 0x318   :  { %v927_v8 = vpop.f32.mrf.mxu1 }
 0x319   :  { %v1009_v1 = vrot.slane %v1008_v25, 4 }
 0x31a   :  { %v1158_v13 = vpop.f32.mrf.mxu1 }
 0x31b   :  { %v1010_v9 = vadd.f32 %v1009_v1, %v1008_v25 }
 0x31c   :  { %v929_v10 = vpop.f32.mrf.mxu1 }
 0x31d   :  { %v1011_v12 = vrot.slane %v1010_v9, 2 }
 0x31f   :  { %v1012_v17 = vadd.f32 %v1011_v12, %v1010_v9 }
 0x321   :  { %v1013_v15 = vrot.slane %v1012_v17, 1 }
 0x323   :  { %v1014_v16 = vadd.f32 %v1013_v15, %v1012_v17 }
 0x325   :  { %v1025_v49 = vadd.f32 %v1024_v23, %v1014_v16 }
 0x327   :  { %1026 = vst [vmem:[%s1654_s6] sm:$0x1] %v1025_v49 }

</bundles_post_ra>
